<compile_context>
chip_gen: v6e
topology: v6e:2x2x1
jax: 0.10.0
libtpu: 0.0.40
codegen_flags: <defaults>
</compile_context>

<pallas_src>
import math

import jax
import jax.numpy as jnp
from jax.experimental import pallas as pl
from jax.experimental.pallas import tpu as pltpu


# ----------------------------------------------------------------------------
# Factor grouping: merge adjacent factors until each group's product >= min_group
# (so the MXU contraction dim is at least 128 wide).  Ordering matches row-major
# flattening, so the grouped weight is kron(W_i, W_{i+1}, ..., W_j).
# ----------------------------------------------------------------------------
def group_factors(factors, min_group=128):
    groups, cur, prod = [], [], 1
    for i, f in enumerate(factors):
        cur.append(i)
        prod *= int(f)
        if prod >= min_group:
            groups.append(cur)
            cur, prod = [], 1
    if cur:
        if groups:
            groups[-1].extend(cur)   # fold the remainder into the last group
        else:
            groups.append(cur)       # whole thing smaller than min_group
    return groups


def _choose_batch_tile(B, D, itemsize):
    # Keep one (tB, D) activation tile under ~2 MiB so the auto-pipeline's double
    # buffers for input + output (~4x) plus the resident weights fit comfortably in
    # the default scoped-VMEM budget on every generation (v5e 16 MiB, v7x 64 MiB
    # physical).  This is still >= thousands of rows for D = 128, well past the
    # tile-size knee in the HBM-roofline sweep.
    cap = max(8, (2 * 1024 * 1024) // max(1, D * itemsize))
    if B <= cap:
        return B
    top = (min(B, cap) // 8) * 8
    for t in range(top, 0, -8):      # largest multiple-of-8 divisor of B
        if B % t == 0:
            return t
    return B


# ----------------------------------------------------------------------------
# Fused kernel: one (tB, D) activation tile, all layers / grouped factors applied
# in-kernel.  refs = (x_ref, w_0, w_1, ..., w_{L*G-1}, o_ref), weights ordered
# [layer major, group minor].
# ----------------------------------------------------------------------------
def make_faclin_kernel(num_layers, group_sizes, tB, D):
    num_groups = len(group_sizes)

    def kernel(*refs):
        x_ref = refs[0]
        o_ref = refs[-1]
        w_refs = refs[1:-1]

        t = x_ref[...].astype(jnp.float32)          # (tB, D), VMEM resident
        for layer in range(num_layers):
            # Contract grouped factors last-to-first with a roll in between, exactly
            # mirroring the classic faclin chain -- but entirely inside VMEM.
            for gi in reversed(range(num_groups)):
                g = group_sizes[gi]
                w = w_refs[layer * num_groups + gi][...]        # (g, g)
                t2 = t.reshape(tB * (D // g), g)
                y = jnp.dot(t2, w, preferred_element_type=jnp.float32)
                if g == D:
                    # Single group per layer: no roll needed (demo path).
                    t = y
                else:
                    t = (
                        y.reshape(tB, D // g, g)
                        .transpose(0, 2, 1)
                        .reshape(tB, D)
                    )
        o_ref[...] = t.astype(o_ref.dtype)

    return kernel


def faclin_forward(x, layers, factors, min_group=128):
    """x: (B, D) with D = prod(factors); layers: list (per inner layer) of
    per-factor square weights [(f1,f1), ..., (fk,fk)]."""
    B, D = x.shape
    factors = tuple(int(f) for f in factors)
    assert D == math.prod(factors)

    groups = group_factors(factors, min_group=min_group)
    group_sizes = tuple(math.prod(factors[i] for i in g) for g in groups)

    # Pre-Kronecker the per-factor weights into grouped weights (tiny, done once).
    grouped_ws = []
    for ws in layers:
        for g in groups:
            w = ws[g[0]]
            for i in g[1:]:
                w = jnp.kron(w, ws[i])
            grouped_ws.append(w)

    num_layers = len(layers)
    tB = _choose_batch_tile(B, D, jnp.dtype(x.dtype).itemsize)
    grid = (B // tB,)

    in_specs = [pl.BlockSpec((tB, D), lambda i: (i, 0))]
    for _ in range(num_layers):
        for gsz in group_sizes:
            # Full (g, g) weight block, VMEM resident across all grid steps.
            in_specs.append(pl.BlockSpec((gsz, gsz), lambda i: (0, 0)))
    out_spec = pl.BlockSpec((tB, D), lambda i: (i, 0))   # lane-dense: last dim = D

    kernel = make_faclin_kernel(num_layers, group_sizes, tB, D)

    fn = pl.pallas_call(
        kernel,
        out_shape=jax.ShapeDtypeStruct((B, D), x.dtype),
        grid_spec=pltpu.PrefetchScalarGridSpec(
            num_scalar_prefetch=0,
            grid=grid,
            in_specs=in_specs,
            out_specs=out_spec,
        ),
        compiler_params=pltpu.CompilerParams(
            dimension_semantics=("parallel",),
        ),
    )
    return fn(x, *grouped_ws)


# ----------------------------------------------------------------------------
# Pure-JAX reference (tensordot per factor axis) for correctness checking.
# ----------------------------------------------------------------------------
def faclin_reference(x, layers, factors):
    B = x.shape[0]
    for ws in layers:
        t = x.reshape((B,) + tuple(factors))
        for i, w in enumerate(ws):
            t = jnp.moveaxis(jnp.tensordot(t, w, axes=([1 + i], [0])), -1, 1 + i)
        x = t.reshape(B, -1)
    return x


if __name__ == "__main__":
    # Small deterministic instantiation:
    #   factors = (8, 16)  -> D = 128
    #   WS has 2 entries   -> 2 stacked inner layers
    #   batch B = 8
    factors = (8, 16)
    num_layers = 2
    B = 8
    D = math.prod(factors)

    key = jax.random.PRNGKey(0)
    layers = []
    for _ in range(num_layers):
        ws = []
        for f in factors:
            key, sub = jax.random.split(key)
            ws.append(
                jax.random.normal(sub, (f, f), jnp.float32) * (1.0 / f) ** 0.5
            )
        layers.append(ws)

    key, sub = jax.random.split(key)
    x = jax.random.normal(sub, (B, D), jnp.float32)

    out = faclin_forward(x, layers, factors)
    out = jax.block_until_ready(out)

    ref = faclin_reference(x, layers, factors)
    assert out.shape == (B, D) and out.dtype == jnp.float32
    assert jnp.allclose(out, ref, atol=1e-4, rtol=1e-4), "mismatch vs reference"

    print("KERNEL_OK")
</pallas_src>

<mosaic_0001>
module attributes {stable_mosaic.version = 11 : i64} {
  func.func @kernel(%arg0: i32, %arg1: memref<8x128xf32, #tpu.memory_space<vmem>>, %arg2: memref<128x128xf32, #tpu.memory_space<vmem>>, %arg3: memref<128x128xf32, #tpu.memory_space<vmem>>, %arg4: memref<8x128xf32, #tpu.memory_space<vmem>>) attributes {dimension_semantics = [#tpu.dimension_semantics<parallel>], iteration_bounds = array<i64: 1>, scalar_prefetch = 0 : i64, scratch_operands = 0 : i64, tpu.core_type = #tpu.core_type<tc>, window_params = [{transform_indices = @transform_0, window_bounds = array<i64: 8, 128>}, {pipeline_mode = #tpu.pipeline_mode<synchronous>, transform_indices = @transform_1, window_bounds = array<i64: 128, 128>}, {pipeline_mode = #tpu.pipeline_mode<synchronous>, transform_indices = @transform_2, window_bounds = array<i64: 128, 128>}, {transform_indices = @transform_3, window_bounds = array<i64: 8, 128>}]} {
    %c0 = arith.constant 0 : index
    %c0_0 = arith.constant 0 : index
    %0 = vector.load %arg1[%c0, %c0_0] : memref<8x128xf32, #tpu.memory_space<vmem>>, vector<8x128xf32>
    %c0_1 = arith.constant 0 : index
    %c0_2 = arith.constant 0 : index
    %1 = vector.load %arg2[%c0_1, %c0_2] : memref<128x128xf32, #tpu.memory_space<vmem>>, vector<128x128xf32>
    %cst = arith.constant dense<0.000000e+00> : vector<8x128xf32>
    %2 = tpu.matmul %0, %1, %cst {dimension_numbers = #tpu.dot_dimension_numbers<[1], [0], [0], [1], [0, 0, 1, 1], [], []>} : vector<8x128xf32>, vector<128x128xf32>, vector<8x128xf32> -> vector<8x128xf32>
    %c0_3 = arith.constant 0 : index
    %c0_4 = arith.constant 0 : index
    %3 = vector.load %arg3[%c0_3, %c0_4] : memref<128x128xf32, #tpu.memory_space<vmem>>, vector<128x128xf32>
    %cst_5 = arith.constant dense<0.000000e+00> : vector<8x128xf32>
    %4 = tpu.matmul %2, %3, %cst_5 {dimension_numbers = #tpu.dot_dimension_numbers<[1], [0], [0], [1], [0, 0, 1, 1], [], []>} : vector<8x128xf32>, vector<128x128xf32>, vector<8x128xf32> -> vector<8x128xf32>
    %c0_6 = arith.constant 0 : index
    %c0_7 = arith.constant 0 : index
    %5 = vector.load %arg4[%c0_6, %c0_7] : memref<8x128xf32, #tpu.memory_space<vmem>>, vector<8x128xf32>
    tpu.vector_store %arg4[%c0_6, %c0_7], %4 {strides = array<i32>} : memref<8x128xf32, #tpu.memory_space<vmem>>, vector<8x128xf32>,
    return
  }
  func.func @transform_0(%arg0: i32) -> (i32, i32) {
    %c0_i32 = arith.constant 0 : i32
    %c0_i32_0 = arith.constant 0 : i32
    return %arg0, %c0_i32 : i32, i32
  }
  func.func @transform_1(%arg0: i32) -> (i32, i32) {
    %c0_i32 = arith.constant 0 : i32
    %c0_i32_0 = arith.constant 0 : i32
    %c0_i32_1 = arith.constant 0 : i32
    return %c0_i32, %c0_i32_0 : i32, i32
  }
  func.func @transform_2(%arg0: i32) -> (i32, i32) {
    %c0_i32 = arith.constant 0 : i32
    %c0_i32_0 = arith.constant 0 : i32
    %c0_i32_1 = arith.constant 0 : i32
    return %c0_i32, %c0_i32_0 : i32, i32
  }
  func.func @transform_3(%arg0: i32) -> (i32, i32) {
    %c0_i32 = arith.constant 0 : i32
    %c0_i32_0 = arith.constant 0 : i32
    return %arg0, %c0_i32 : i32, i32
  }
}

</mosaic_0001>

<bundles_post_ra>
// kernel: tpu_custom_call.1
= control target key start
LH: loop header
LB: loop body
LE: loop exit
PB: predicated region body
PF: predicated region fallthrough
CT: control target
= control target key end

     0   :  { %8 = vsyncpa [#allocation3], 0  ;;  %s516_s0 = inlined_call_operand.hbm [shape: f32[8,128], index: 0, kind: input, shape index: {}]   ;;  %s517_s1 = inlined_call_operand.hbm [shape: f32[128,128], index: 1, kind: input, shape index: {}]   ;;  %s518_s2 = inlined_call_operand.hbm [shape: f32[128,128], index: 2, kind: input, shape index: {}]   ;;  %s519_s3 = inlined_call_operand.hbm [shape: f32[8,128], index: 3, kind: output, shape index: {}]  }
   0x1   :  { %9 = vsyncpa [#allocation6], 0 }
   0x2   :  { %10 = vsyncpa [#allocation4], 0  ;;  %s442_s12 = smov [#allocation5]  }
   0x3   :  { %s26_s13 = sshll.u32 %s442_s12, 4  ;;  %s27_s13 = int_to_ptr.vmem [resolvable:$true] %s26_s13 }
   0x4   :  { %s364_s14 = scalar_lea.vmem %s27_s13, 2048  ;;  %p369_p1 = scmp.lt.s32.totalorder %s27_s13, %s27_s13 }
   0x5   :  { %p365_p0 = scmp.ne.s32.totalorder %s27_s13, %s364_s14  ;;  %p370_p2 = scmp.lt.s32.totalorder %s364_s14, %s364_s14 }
   0x7   :  { %p371_p3 = por %p370_p2, %p369_p1 }
   0x9   :  { %p372_p4 = pnand %p371_p3, %p365_p0 }
   0xb   :  { %375 = shalt.err (!%p372_p4)
}
   0xc   :  { %s443_s15 = smov 128   ;;  %s444_s16 = smov 8  }
   0xd   :  { %32 = dma.hbm_to_vmem [thread:$0]  %s517_s1, 2048, %s27_s13, [#allocation6], %s443_s15, %s443_s15, %s444_s16  }
   0xe   :  { %s445_s19 = smov [#allocation2]   ;;  %s446_s21 = smov [#allocation7]  }
   0xf   :  { %s17_s20 = sshll.u32 %s445_s19, 4  ;;  %s38_s22 = sshll.u32 %s446_s21, 4  ;;  %s18_s20 = int_to_ptr.vmem [resolvable:$true] %s17_s20  ;;  %s39_s22 = int_to_ptr.vmem [resolvable:$true] %s38_s22 }
  0x10   :  { %s384_s23 = scalar_lea.vmem %s18_s20, 128  ;;  %p389_p6 = scmp.lt.s32.totalorder %s18_s20, %s18_s20 }
  0x11   :  { %p385_p5 = scmp.ne.s32.totalorder %s18_s20, %s384_s23  ;;  %p390_p7 = scmp.lt.s32.totalorder %s384_s23, %s384_s23 }
  0x13   :  { %p391_p8 = por %p390_p7, %p389_p6 }
  0x15   :  { %p392_p9 = pnand %p391_p8, %p385_p5 }
  0x17   :  { %395 = shalt.err (!%p392_p9)
}
  0x18   :  { %20 = dma.hbm_to_vmem [thread:$0]  %s516_s0, 128, %s18_s20, [#allocation3]  }
  0x19   :  { %s404_s26 = scalar_lea.vmem %s39_s22, 2048  ;;  %p409_p11 = scmp.lt.s32.totalorder %s39_s22, %s39_s22 }
  0x1a   :  { %p405_p10 = scmp.ne.s32.totalorder %s39_s22, %s404_s26  ;;  %p410_p12 = scmp.lt.s32.totalorder %s404_s26, %s404_s26 }
  0x1c   :  { %p411_p13 = por %p410_p12, %p409_p11 }
  0x1e   :  { %p412_p0 = pnand %p411_p13, %p405_p10 }
  0x20   :  { %415 = shalt.err (!%p412_p0)
}
  0x21   :  { %44 = dma.hbm_to_vmem [thread:$0]  %s518_s2, 2048, %s39_s22, [#allocation6], %s443_s15, %s443_s15, %s444_s16  }
  0x22   :  { %436 = dma.done.wait [#allocation3], 128  }
  0x23   :  { %437 = vsyncadd [#allocation3], 4294967168 }
  0x24   :  { %438 = dma.done.wait [#allocation6], 4096  }
  0x25   :  { %439 = vsyncadd [#allocation6], 4294963200  ;;  %v447_v0 = vmov 0.0   ;;  %vm448_vm0 = vmmov 0   ;;  %v70_v1 = vld [vmem:[#allocation5 + $0x78] sm:$0xff]  ;;  %v69_v2 = vld [vmem:[#allocation5 + $0x70] sm:$0xff] }
  0x26   :  { %278 = vmatprep.subr.mxu0 %v447_v0  ;;  %310 = vmatprep.mubr.msk.f32.mxu0 %vm448_vm0, %v447_v0  ;;  %v68_v3 = vld [vmem:[#allocation5 + $0x68] sm:$0xff]  ;;  %v67_v4 = vld [vmem:[#allocation5 + $0x60] sm:$0xff]  ;;  %v156_v5 = vld [vmem:[#allocation7 + $0x78] sm:$0xff]  ;;  %s449_s0 = smov [#allocation8]  }
  0x27   :  { %313 = vmatprep.subr.mxu1 %v447_v0  ;;  %345 = vmatprep.mubr.msk.f32.mxu1 %vm448_vm0, %v447_v0  ;;  %v66_v6 = vld [vmem:[#allocation5 + $0x58] sm:$0xff]  ;;  %v155_v7 = vld [vmem:[#allocation7 + $0x70] sm:$0xff]  ;;  %v154_v8 = vld [vmem:[#allocation7 + $0x68] sm:$0xff]  ;;  %s234_s2 = sshll.u32 %s449_s0, 4  ;;  %s235_s2 = int_to_ptr.vmem [resolvable:$true] %s234_s2 }
  0x28   :  { %279 = vmatpush3.msra.mxu0 %v70_v1  ;;  %314 = vmatpush3.msra.mxu1 %v156_v5  ;;  %v65_v9 = vld [vmem:[#allocation5 + $0x50] sm:$0xff]  ;;  %v153_v10 = vld [vmem:[#allocation7 + $0x60] sm:$0xff]  ;;  %v64_v11 = vld [vmem:[#allocation5 + $0x48] sm:$0xff]  ;;  %s416_s28 = scalar_lea.vmem %s235_s2, 128  ;;  %p421_p2 = scmp.lt.s32.totalorder %s235_s2, %s235_s2 }
  0x29   :  { %280 = vmatprep.subr.mxu0 %v447_v0  ;;  %315 = vmatprep.subr.mxu1 %v447_v0  ;;  %v152_v12 = vld [vmem:[#allocation7 + $0x58] sm:$0xff]  ;;  %v63_v13 = vld [vmem:[#allocation5 + $0x40] sm:$0xff]  ;;  %v151_v14 = vld [vmem:[#allocation7 + $0x50] sm:$0xff]  ;;  %p417_p1 = scmp.ne.s32.totalorder %s235_s2, %s416_s28  ;;  %p422_p3 = scmp.lt.s32.totalorder %s416_s28, %s416_s28 }
  0x2a   :  { %281 = vmatpush3.msra.mxu0 %v69_v2  ;;  %316 = vmatpush3.msra.mxu1 %v155_v7  ;;  %v62_v15 = vld [vmem:[#allocation5 + $0x38] sm:$0xff]  ;;  %v150_v16 = vld [vmem:[#allocation7 + $0x48] sm:$0xff]  ;;  %v61_v17 = vld [vmem:[#allocation5 + $0x30] sm:$0xff] }
  0x2b   :  { %282 = vmatprep.subr.mxu0 %v447_v0  ;;  %317 = vmatprep.subr.mxu1 %v447_v0  ;;  %v149_v18 = vld [vmem:[#allocation7 + $0x40] sm:$0xff]  ;;  %v60_v19 = vld [vmem:[#allocation5 + $0x28] sm:$0xff]  ;;  %v148_v20 = vld [vmem:[#allocation7 + $0x38] sm:$0xff]  ;;  %p423_p4 = por %p422_p3, %p421_p2 }
  0x2c   :  { %283 = vmatpush3.msra.mxu0 %v68_v3  ;;  %318 = vmatpush3.msra.mxu1 %v154_v8  ;;  %v59_v21 = vld [vmem:[#allocation5 + $0x20] sm:$0xff]  ;;  %v147_v22 = vld [vmem:[#allocation7 + $0x30] sm:$0xff]  ;;  %v58_v23 = vld [vmem:[#allocation5 + $0x18] sm:$0xff] }
  0x2d   :  { %284 = vmatprep.subr.mxu0 %v447_v0  ;;  %319 = vmatprep.subr.mxu1 %v447_v0  ;;  %v146_v24 = vld [vmem:[#allocation7 + $0x28] sm:$0xff]  ;;  %v57_v25 = vld [vmem:[#allocation5 + $0x10] sm:$0xff]  ;;  %v145_v26 = vld [vmem:[#allocation7 + $0x20] sm:$0xff]  ;;  %p424_p5 = pnand %p423_p4, %p417_p1 }
  0x2e   :  { %285 = vmatpush3.msra.mxu0 %v67_v4  ;;  %320 = vmatpush3.msra.mxu1 %v153_v10  ;;  %v56_v27 = vld [vmem:[#allocation5 + $0x8] sm:$0xff]  ;;  %v144_v28 = vld [vmem:[#allocation7 + $0x18] sm:$0xff]  ;;  %v55_v29 = vld [vmem:[#allocation5] sm:$0xff] }
  0x2f   :  { %286 = vmatprep.subr.mxu0 %v447_v0  ;;  %321 = vmatprep.subr.mxu1 %v447_v0  ;;  %v54_v30 = vld [vmem:[#allocation2] sm:$0xff]  ;;  %v143_v31 = vld [vmem:[#allocation7 + $0x10] sm:$0xff]  ;;  %v142_v32 = vld [vmem:[#allocation7 + $0x8] sm:$0xff] }
  0x30   :  { %287 = vmatpush3.msra.mxu0 %v66_v6  ;;  %322 = vmatpush3.msra.mxu1 %v152_v12  ;;  %v141_v33 = vld [vmem:[#allocation7] sm:$0xff] }
  0x31   :  { %288 = vmatprep.subr.mxu0 %v447_v0  ;;  %323 = vmatprep.subr.mxu1 %v447_v0 }
  0x32   :  { %289 = vmatpush3.msra.mxu0 %v65_v9  ;;  %324 = vmatpush3.msra.mxu1 %v151_v14 }
  0x33   :  { %290 = vmatprep.subr.mxu0 %v447_v0  ;;  %325 = vmatprep.subr.mxu1 %v447_v0 }
  0x34   :  { %291 = vmatpush3.msra.mxu0 %v64_v11  ;;  %326 = vmatpush3.msra.mxu1 %v150_v16 }
  0x35   :  { %292 = vmatprep.subr.mxu0 %v447_v0  ;;  %327 = vmatprep.subr.mxu1 %v447_v0 }
  0x36   :  { %293 = vmatpush3.msra.mxu0 %v63_v13  ;;  %328 = vmatpush3.msra.mxu1 %v149_v18 }
  0x37   :  { %294 = vmatprep.subr.mxu0 %v447_v0  ;;  %329 = vmatprep.subr.mxu1 %v447_v0 }
  0x38   :  { %295 = vmatpush3.msra.mxu0 %v62_v15  ;;  %330 = vmatpush3.msra.mxu1 %v148_v20 }
  0x39   :  { %296 = vmatprep.subr.mxu0 %v447_v0  ;;  %331 = vmatprep.subr.mxu1 %v447_v0 }
  0x3a   :  { %297 = vmatpush3.msra.mxu0 %v61_v17  ;;  %332 = vmatpush3.msra.mxu1 %v147_v22 }
  0x3b   :  { %298 = vmatprep.subr.mxu0 %v447_v0  ;;  %333 = vmatprep.subr.mxu1 %v447_v0 }
  0x3c   :  { %299 = vmatpush3.msra.mxu0 %v60_v19  ;;  %334 = vmatpush3.msra.mxu1 %v146_v24 }
  0x3d   :  { %300 = vmatprep.subr.mxu0 %v447_v0  ;;  %335 = vmatprep.subr.mxu1 %v447_v0 }
  0x3e   :  { %301 = vmatpush3.msra.mxu0 %v59_v21  ;;  %336 = vmatpush3.msra.mxu1 %v145_v26 }
  0x3f   :  { %302 = vmatprep.subr.mxu0 %v447_v0  ;;  %337 = vmatprep.subr.mxu1 %v447_v0 }
  0x40   :  { %303 = vmatpush3.msra.mxu0 %v58_v23  ;;  %338 = vmatpush3.msra.mxu1 %v144_v28 }
  0x41   :  { %304 = vmatprep.subr.mxu0 %v447_v0  ;;  %339 = vmatprep.subr.mxu1 %v447_v0 }
  0x42   :  { %305 = vmatpush3.msra.mxu0 %v57_v25  ;;  %340 = vmatpush3.msra.mxu1 %v143_v31 }
  0x43   :  { %306 = vmatprep.subr.mxu0 %v447_v0  ;;  %341 = vmatprep.subr.mxu1 %v447_v0 }
  0x44   :  { %307 = vmatpush3.msra.mxu0 %v56_v27  ;;  %342 = vmatpush3.msra.mxu1 %v142_v32 }
  0x45   :  { %308 = vmatprep.subr.mxu0 %v447_v0  ;;  %343 = vmatprep.subr.mxu1 %v447_v0 }
  0x46   :  { %309 = vmatpush3.msra.mxu0 %v55_v29  ;;  %344 = vmatpush3.msra.mxu1 %v141_v33 }
  0x47   :  { %311 = vmatmul.mubr.f32.vlgmr.msra.gmra.mxu0 %v54_v30 }
 0x107   :  { %v137_v34 = vpop.f32.mrf.mxu0 }
 0x108   :  { %346 = vmatmul.mubr.f32.vlgmr.msra.gmra.mxu1 %v137_v34 }
 0x109   :  { %v312_v35 = vpop.f32.mrf.mxu0 }
 0x1c8   :  { %v223_v36 = vpop.f32.mrf.mxu1 }
 0x1c9   :  { %227 = vst [vmem:[#allocation8] sm:$0xff] %v223_v36 }
 0x1ca   :  { %v347_v37 = vpop.f32.mrf.mxu1 }
 0x1cb   :  { %427 = shalt.err (!%p424_p5)
}
 0x1cc   :  { %237 = dma.vmem_to_hbm [thread:$0]  %s235_s2, 128, %s519_s3, [#allocation4]  }
 0x1cd   :  { %440 = dma.done.wait [#allocation4], 128  }
 0x1ce   :  { %441 = vsyncadd [#allocation4], 4294967168 }
 0x1cf   :  { %241 = vsyncpa [#allocation3], 1 }
 0x1d0   :  { %242 = vsyncpa [#allocation6], 1 }
 0x1d1   :  { %243 = vsyncpa [#allocation4], 1 }

</bundles_post_ra>
